<compile_context>
chip_gen: v5e
topology: v5e:2x2
jax: 0.10.0
libtpu: 0.0.40
codegen_flags: <defaults>
</compile_context>

<pallas_src>
import jax
import jax.numpy as jnp
from jax.experimental import pallas as pl
from jax.experimental.pallas import tpu as pltpu


# ---------------------------------------------------------------------------
# forward(): famp.expand(B, -1, -1, -1)  -- pure broadcast, no kernel needed
# ---------------------------------------------------------------------------
def triplane_forward(famp, batch):
    # (1, 3C, H, W) -> (batch, 3C, H, W).  A Pallas kernel here only adds HBM
    # traffic; the sampler below prefers the un-expanded parameter anyway.
    return jnp.broadcast_to(famp, (batch,) + tuple(famp.shape[1:]))


# ---------------------------------------------------------------------------
# sample_feat(): triplane_sample(xyz, fmap)   (the hot path)
# ---------------------------------------------------------------------------
_AXIS_PAIRS = ((0, 1), (1, 2), (2, 0))   # plane p samples (xyz[a1] -> W, xyz[a2] -> H)


def _make_sample_kernel(H, W, C, tile_n):
    def kernel(xyz_ref, fmap_ref, out_ref):
        xyz_t = xyz_ref[0]                                   # (3, tile_n), pts on lanes
        col_w = jax.lax.broadcasted_iota(jnp.int32, (W, tile_n), 0)
        row_h = jax.lax.broadcasted_iota(jnp.int32, (H, tile_n), 0)

        for p, (a1, a2) in enumerate(_AXIS_PAIRS):
            ix = (xyz_t[a1:a1 + 1, :] + 1.0) * (0.5 * (W - 1))   # (1, tile_n) f32
            iy = (xyz_t[a2:a2 + 1, :] + 1.0) * (0.5 * (H - 1))   # (1, tile_n) f32
            x0f = jnp.floor(ix)
            y0f = jnp.floor(iy)
            fx = ix - x0f                                        # bilinear fractions
            fy = iy - y0f
            # int32 corner indices (no f32 flat-index exactness issues).
            x0 = x0f.astype(jnp.int32)
            y0 = y0f.astype(jnp.int32)
            cx0 = jnp.clip(x0, 0, W - 1)
            cx1 = jnp.clip(x0 + 1, 0, W - 1)
            cy0 = jnp.clip(y0, 0, H - 1)
            cy1 = jnp.clip(y0 + 1, 0, H - 1)

            # Weighted one-hots, tile_n lane-dense.  Clamped duplicate corners add
            # their weights -> identical to torch's gather-with-clamped-indices.
            oxT = (jnp.where(col_w == cx0, 1.0 - fx, 0.0)
                   + jnp.where(col_w == cx1, fx, 0.0))           # (W, tile_n)
            oyT = (jnp.where(row_h == cy0, 1.0 - fy, 0.0)
                   + jnp.where(row_h == cy1, fy, 0.0))           # (H, tile_n)

            plane = fmap_ref[0, p]                               # (C*H, W), VMEM resident
            # Stage 1 (MXU): contract W.  (C*H, W) @ (W, tile_n) -> (C*H, tile_n).
            t = jax.lax.dot_general(
                plane, oxT.astype(plane.dtype),
                dimension_numbers=(((1,), (0,)), ((), ())),
                preferred_element_type=jnp.float32)
            # Stage 2: weight by the y one-hot and reduce over H (tiny: C*H*tile_n).
            t3 = t.reshape(C, H, tile_n)
            out_ref[0, p] = jnp.sum(t3 * oyT[None, :, :], axis=1
                                    ).astype(out_ref.dtype)      # (C, tile_n) store
    return kernel


def triplane_sample_pallas(xyz, fmap, *, tile_n=256, compute_dtype=None,
                           interpret=False):
    """xyz: (B, *pts, 3) in [-1, 1];  fmap: (1 or B, 3C, H, W)  ->  (B, *pts, 3C).

    Passing the un-expanded parameter (batch dim 1) is the fast path: the planes
    are DMA'd to VMEM once and the batch is folded into the point axis.
    With compute_dtype=jnp.bfloat16 planes/MXU operands are bf16 (f32 accumulate,
    f32 weight/index math); expect ~1e-3 relative error in that mode.
    """
    B = xyz.shape[0]
    pts_shape = tuple(xyz.shape[1:-1])
    assert xyz.shape[-1] == 3
    N = 1
    for s in pts_shape:
        N *= int(s)

    Bf, C3, H, W = fmap.shape
    C = C3 // 3
    assert C3 == 3 * C
    assert Bf in (1, B)

    plane_dtype = jnp.float32 if compute_dtype is None else compute_dtype
    # Pure reshape (no transpose): (Bf, 3C, H, W) -> (Bf, 3, C*H, W).
    fmap_k = fmap.reshape(Bf, 3, C * H, W).astype(plane_dtype)

    xyz_flat = xyz.reshape(B, N, 3).astype(jnp.float32)

    if Bf == 1:
        # Fold batch into points: one padding tail, fewer grid steps, better
        # load balance across v7x's two TensorCores for small B.
        total = B * N
        n_pad = int(pl.cdiv(total, tile_n)) * tile_n
        pts = xyz_flat.reshape(1, total, 3)
        if n_pad != total:
            pts = jnp.pad(pts, ((0, 0), (0, n_pad - total), (0, 0)))
        xyz_t = jnp.transpose(pts, (0, 2, 1))                # (1, 3, n_pad)
        grid = (n_pad // tile_n,)
        xyz_spec = pl.BlockSpec((1, 3, tile_n), lambda n: (0, 0, n))
        # Constant index map -> planes stay VMEM-resident across the whole grid.
        # TODO(synk): on v7x, single-buffer this constant block (pl.Buffered(1) /
        # manual copy) to halve the resident-plane VMEM for large H*W.
        fmap_spec = pl.BlockSpec((1, 3, C * H, W), lambda n: (0, 0, 0, 0))
        out_spec = pl.BlockSpec((1, 3, C, tile_n), lambda n: (0, 0, 0, n))
        out_batch = 1
        sem = ("parallel",)
    else:
        n_pad = int(pl.cdiv(N, tile_n)) * tile_n
        pts = xyz_flat
        if n_pad != N:
            pts = jnp.pad(pts, ((0, 0), (0, n_pad - N), (0, 0)))
        xyz_t = jnp.transpose(pts, (0, 2, 1))                # (B, 3, n_pad)
        grid = (B, n_pad // tile_n)
        xyz_spec = pl.BlockSpec((1, 3, tile_n), lambda b, n: (b, 0, n))
        fmap_spec = pl.BlockSpec((1, 3, C * H, W), lambda b, n: (b, 0, 0, 0))
        out_spec = pl.BlockSpec((1, 3, C, tile_n), lambda b, n: (b, 0, 0, n))
        out_batch = B
        sem = ("parallel", "parallel")

    steps = 1
    for g in grid:
        steps *= int(g)

    # Cost model for the separable form.
    cost = pl.CostEstimate(
        flops=steps * 3 * (2 * C * H * W + 2 * C * H) * tile_n,
        transcendentals=0,
        bytes_accessed=int(fmap_k.size * fmap_k.dtype.itemsize
                           + xyz_t.size * 4
                           + out_batch * 3 * C * n_pad * 4),
    )

    # VMEM footprint estimate (lane/sublane padding rounded up); only override the
    # default scoped limit when it would actually be exceeded.
    item = jnp.dtype(plane_dtype).itemsize
    w_pad = int(pl.cdiv(W, 128)) * 128
    ch_pad = int(pl.cdiv(C * H, 8)) * 8
    fmap_blk = 3 * ch_pad * w_pad * item
    xyz_blk = 8 * tile_n * 4
    out_blk = 3 * max(C, 8) * tile_n * 4
    scratch = 4 * (ch_pad * tile_n * 4 + (H + W + 16) * tile_n * 4)
    est = 2 * fmap_blk + 2 * xyz_blk + 2 * out_blk + scratch
    vmem_limit = None
    if est > (12 << 20):
        vmem_limit = int(min(max(est * 3 // 2, 16 << 20), 64 << 20))

    out = pl.pallas_call(
        _make_sample_kernel(H, W, C, tile_n),
        out_shape=jax.ShapeDtypeStruct((out_batch, 3, C, n_pad), jnp.float32),
        grid=grid,
        in_specs=[xyz_spec, fmap_spec],
        out_specs=out_spec,
        compiler_params=pltpu.CompilerParams(
            dimension_semantics=sem, vmem_limit_bytes=vmem_limit),
        cost_estimate=cost,
        interpret=interpret,
    )(xyz_t, fmap_k)

    # Restore the torch (B, *pts, 3C) layout (required by the module contract;
    # drop this transpose if the consumer accepts channels-first).
    if Bf == 1:
        feat = jnp.transpose(out[0, :, :, :B * N], (2, 0, 1))      # (B*N, 3, C)
    else:
        feat = jnp.transpose(out[:, :, :, :N], (0, 3, 1, 2))       # (B, N, 3, C)
    return feat.reshape((B,) + pts_shape + (3 * C,))


# ---------------------------------------------------------------------------
# Pure-JAX reference (direct translation of the torch code) for validation
# ---------------------------------------------------------------------------
def _grid_sample_ref(image, p2d):
    B, C, IH, IW = image.shape
    img = image.reshape(B, C, IH * IW)
    pts_shape = p2d.shape[1:-1]
    p2 = p2d.reshape(B, -1, 2)
    ix = (p2[..., 0] + 1) / 2 * (IW - 1)
    iy = (p2[..., 1] + 1) / 2 * (IH - 1)
    ix_nw = jnp.floor(ix); iy_nw = jnp.floor(iy)
    ix_ne = ix_nw + 1; iy_ne = iy_nw
    ix_sw = ix_nw; iy_sw = iy_nw + 1
    ix_se = ix_nw + 1; iy_se = iy_nw + 1
    nw = (ix_se - ix) * (iy_se - iy)
    ne = (ix - ix_sw) * (iy_sw - iy)
    sw = (ix_ne - ix) * (iy - iy_ne)
    se = (ix - ix_nw) * (iy - iy_nw)

    def gather(jx, jy):
        jx = jnp.clip(jx, 0, IW - 1)
        jy = jnp.clip(jy, 0, IH - 1)
        idx = (jy * IW + jx).astype(jnp.int32)                    # (B, Np)
        return jnp.take_along_axis(img, idx[:, None, :], axis=2)  # (B, C, Np)

    out = (gather(ix_nw, iy_nw) * nw[:, None, :]
           + gather(ix_ne, iy_ne) * ne[:, None, :]
           + gather(ix_sw, iy_sw) * sw[:, None, :]
           + gather(ix_se, iy_se) * se[:, None, :])
    return out.transpose(0, 2, 1).reshape((B,) + tuple(pts_shape) + (C,))


def _triplane_sample_ref(xyz, fmap):
    C = fmap.shape[1] // 3
    outs = []
    for f, (a1, a2) in zip(range(3), _AXIS_PAIRS):
        p2d = jnp.stack([xyz[..., a1], xyz[..., a2]], axis=-1)
        outs.append(_grid_sample_ref(fmap[:, f * C:(f + 1) * C], p2d))
    return jnp.concatenate(outs, axis=-1)


if __name__ == "__main__":
    key = jax.random.PRNGKey(0)
    k1, k2, k3 = jax.random.split(key, 3)

    feat_dim, feat_size = 4, 16     # module __init__ args
    B, N = 2, 200                   # batch, number of sample points (tests padding)

    # deterministic parameter init (torch.randn(...) * 0.03 equivalent)
    famp = jax.random.normal(
        k1, (1, 3 * feat_dim, feat_size, feat_size), dtype=jnp.float32) * 0.03
    # forward() only uses input.shape[0]
    x_in = jax.random.normal(k2, (B, 8), dtype=jnp.float32)
    xyz = jax.random.uniform(k3, (B, N, 3), minval=-1.0, maxval=1.0,
                             dtype=jnp.float32)

    # forward: expand parameter to batch (pure broadcast)
    fmap = triplane_forward(famp, x_in.shape[0])
    jax.block_until_ready(fmap)
    assert fmap.shape == (B, 3 * feat_dim, feat_size, feat_size)
    assert jnp.allclose(fmap, jnp.broadcast_to(famp, fmap.shape))

    # sample_feat hot path: sample directly from the un-expanded parameter
    feats = triplane_sample_pallas(xyz, famp)
    jax.block_until_ready(feats)
    # also accept the batch-expanded fmap (module API) -> per-batch plane indexing
    feats2 = triplane_sample_pallas(xyz, fmap)
    jax.block_until_ready(feats2)

    ref = _triplane_sample_ref(xyz, fmap)
    assert feats.shape == (B, N, 3 * feat_dim)
    assert jnp.allclose(feats, ref, atol=1e-5, rtol=1e-5)
    assert jnp.allclose(feats2, ref, atol=1e-5, rtol=1e-5)

    print("KERNEL_OK")
</pallas_src>

<mosaic_0001>
module attributes {stable_mosaic.version = 11 : i64} {
  func.func @kernel(%arg0: i32, %arg1: memref<1x3x256xf32, #tpu.memory_space<vmem>>, %arg2: memref<1x3x64x16xf32, #tpu.memory_space<vmem>>, %arg3: memref<1x3x4x256xf32, #tpu.memory_space<vmem>>) attributes {dimension_semantics = [#tpu.dimension_semantics<parallel>], iteration_bounds = array<i64: 2>, scalar_prefetch = 0 : i64, scratch_operands = 0 : i64, tpu.core_type = #tpu.core_type<tc>, window_params = [{transform_indices = @transform_0, window_bounds = array<i64: 1, 3, 256>}, {pipeline_mode = #tpu.pipeline_mode<synchronous>, transform_indices = @transform_1, window_bounds = array<i64: 1, 3, 64, 16>}, {transform_indices = @transform_2, window_bounds = array<i64: 1, 3, 4, 256>}]} {
    %c0 = arith.constant 0 : index
    %c0_0 = arith.constant 0 : index
    %c0_1 = arith.constant 0 : index
    %0 = vector.load %arg1[%c0, %c0_0, %c0_1] : memref<1x3x256xf32, #tpu.memory_space<vmem>>, vector<1x3x256xf32>
    %1 = vector.shape_cast %0 : vector<1x3x256xf32> to vector<3x256xf32>
    %2 = tpu.iota {dimensions = array<i32: 0>} : vector<16x256xi32>
    %3 = tpu.iota {dimensions = array<i32: 0>} : vector<16x256xi32>
    %4 = vector.extract_strided_slice %1 {offsets = [0, 0], sizes = [1, 256], strides = [1, 1]} : vector<3x256xf32> to vector<1x256xf32>
    %cst = arith.constant 1.000000e+00 : f32
    %5 = vector.broadcast %cst : f32 to vector<1x256xf32>
    %6 = arith.addf %4, %5 : vector<1x256xf32>
    %cst_2 = arith.constant 7.500000e+00 : f32
    %7 = vector.broadcast %cst_2 : f32 to vector<1x256xf32>
    %8 = arith.mulf %6, %7 : vector<1x256xf32>
    %9 = vector.extract_strided_slice %1 {offsets = [1, 0], sizes = [1, 256], strides = [1, 1]} : vector<3x256xf32> to vector<1x256xf32>
    %cst_3 = arith.constant 1.000000e+00 : f32
    %10 = vector.broadcast %cst_3 : f32 to vector<1x256xf32>
    %11 = arith.addf %9, %10 : vector<1x256xf32>
    %cst_4 = arith.constant 7.500000e+00 : f32
    %12 = vector.broadcast %cst_4 : f32 to vector<1x256xf32>
    %13 = arith.mulf %11, %12 : vector<1x256xf32>
    %14 = math.floor %8 : vector<1x256xf32>
    %15 = math.floor %13 : vector<1x256xf32>
    %16 = arith.subf %8, %14 : vector<1x256xf32>
    %17 = arith.subf %13, %15 : vector<1x256xf32>
    %18 = arith.fptosi %14 : vector<1x256xf32> to vector<1x256xi32>
    %19 = arith.fptosi %15 : vector<1x256xf32> to vector<1x256xi32>
    %c0_i32 = arith.constant 0 : i32
    %c15_i32 = arith.constant 15 : i32
    %20 = vector.broadcast %c0_i32 : i32 to vector<1x256xi32>
    %21 = arith.maxsi %20, %18 : vector<1x256xi32>
    %22 = vector.broadcast %c15_i32 : i32 to vector<1x256xi32>
    %23 = arith.minsi %22, %21 : vector<1x256xi32>
    %c1_i32 = arith.constant 1 : i32
    %24 = vector.broadcast %c1_i32 : i32 to vector<1x256xi32>
    %25 = arith.addi %18, %24 : vector<1x256xi32>
    %c0_i32_5 = arith.constant 0 : i32
    %c15_i32_6 = arith.constant 15 : i32
    %26 = vector.broadcast %c0_i32_5 : i32 to vector<1x256xi32>
    %27 = arith.maxsi %26, %25 : vector<1x256xi32>
    %28 = vector.broadcast %c15_i32_6 : i32 to vector<1x256xi32>
    %29 = arith.minsi %28, %27 : vector<1x256xi32>
    %c0_i32_7 = arith.constant 0 : i32
    %c15_i32_8 = arith.constant 15 : i32
    %30 = vector.broadcast %c0_i32_7 : i32 to vector<1x256xi32>
    %31 = arith.maxsi %30, %19 : vector<1x256xi32>
    %32 = vector.broadcast %c15_i32_8 : i32 to vector<1x256xi32>
    %33 = arith.minsi %32, %31 : vector<1x256xi32>
    %c1_i32_9 = arith.constant 1 : i32
    %34 = vector.broadcast %c1_i32_9 : i32 to vector<1x256xi32>
    %35 = arith.addi %19, %34 : vector<1x256xi32>
    %c0_i32_10 = arith.constant 0 : i32
    %c15_i32_11 = arith.constant 15 : i32
    %36 = vector.broadcast %c0_i32_10 : i32 to vector<1x256xi32>
    %37 = arith.maxsi %36, %35 : vector<1x256xi32>
    %38 = vector.broadcast %c15_i32_11 : i32 to vector<1x256xi32>
    %39 = arith.minsi %38, %37 : vector<1x256xi32>
    %40 = vector.broadcast %23 : vector<1x256xi32> to vector<16x256xi32>
    %41 = arith.cmpi eq, %2, %40 : vector<16x256xi32>
    %cst_12 = arith.constant 1.000000e+00 : f32
    %42 = vector.broadcast %cst_12 : f32 to vector<1x256xf32>
    %43 = arith.subf %42, %16 : vector<1x256xf32>
    %cst_13 = arith.constant 0.000000e+00 : f32
    %44 = vector.shape_cast %43 : vector<1x256xf32> to vector<1x256xf32>
    %45 = vector.broadcast %44 : vector<1x256xf32> to vector<16x256xf32>
    %46 = vector.broadcast %cst_13 : f32 to vector<16x256xf32>
    %47 = arith.select %41, %45, %46 : vector<16x256xi1>, vector<16x256xf32>
    %48 = vector.broadcast %29 : vector<1x256xi32> to vector<16x256xi32>
    %49 = arith.cmpi eq, %2, %48 : vector<16x256xi32>
    %cst_14 = arith.constant 0.000000e+00 : f32
    %50 = vector.shape_cast %16 : vector<1x256xf32> to vector<1x256xf32>
    %51 = vector.broadcast %50 : vector<1x256xf32> to vector<16x256xf32>
    %52 = vector.broadcast %cst_14 : f32 to vector<16x256xf32>
    %53 = arith.select %49, %51, %52 : vector<16x256xi1>, vector<16x256xf32>
    %54 = arith.addf %47, %53 : vector<16x256xf32>
    %55 = vector.broadcast %33 : vector<1x256xi32> to vector<16x256xi32>
    %56 = arith.cmpi eq, %3, %55 : vector<16x256xi32>
    %cst_15 = arith.constant 1.000000e+00 : f32
    %57 = vector.broadcast %cst_15 : f32 to vector<1x256xf32>
    %58 = arith.subf %57, %17 : vector<1x256xf32>
    %cst_16 = arith.constant 0.000000e+00 : f32
    %59 = vector.shape_cast %58 : vector<1x256xf32> to vector<1x256xf32>
    %60 = vector.broadcast %59 : vector<1x256xf32> to vector<16x256xf32>
    %61 = vector.broadcast %cst_16 : f32 to vector<16x256xf32>
    %62 = arith.select %56, %60, %61 : vector<16x256xi1>, vector<16x256xf32>
    %63 = vector.broadcast %39 : vector<1x256xi32> to vector<16x256xi32>
    %64 = arith.cmpi eq, %3, %63 : vector<16x256xi32>
    %cst_17 = arith.constant 0.000000e+00 : f32
    %65 = vector.shape_cast %17 : vector<1x256xf32> to vector<1x256xf32>
    %66 = vector.broadcast %65 : vector<1x256xf32> to vector<16x256xf32>
    %67 = vector.broadcast %cst_17 : f32 to vector<16x256xf32>
    %68 = arith.select %64, %66, %67 : vector<16x256xi1>, vector<16x256xf32>
    %69 = arith.addf %62, %68 : vector<16x256xf32>
    %c0_18 = arith.constant 0 : index
    %c0_19 = arith.constant 0 : index
    %c0_20 = arith.constant 0 : index
    %c0_21 = arith.constant 0 : index
    %70 = vector.load %arg2[%c0_18, %c0_19, %c0_20, %c0_21] : memref<1x3x64x16xf32, #tpu.memory_space<vmem>>, vector<1x1x64x16xf32>
    %71 = vector.shape_cast %70 : vector<1x1x64x16xf32> to vector<64x16xf32>
    %cst_22 = arith.constant dense<0.000000e+00> : vector<64x256xf32>
    %72 = tpu.matmul %71, %54, %cst_22 {dimension_numbers = #tpu.dot_dimension_numbers<[1], [0], [0], [1], [0, 0, 1, 1], [], []>} : vector<64x16xf32>, vector<16x256xf32>, vector<64x256xf32> -> vector<64x256xf32>
    %73 = vector.shape_cast %72 : vector<64x256xf32> to vector<4x16x256xf32>
    %74 = vector.shape_cast %69 : vector<16x256xf32> to vector<1x16x256xf32>
    %75 = vector.broadcast %74 : vector<1x16x256xf32> to vector<4x16x256xf32>
    %76 = arith.mulf %73, %75 : vector<4x16x256xf32>
    %cst_23 = arith.constant dense<0.000000e+00> : vector<4x256xf32>
    %77 = vector.multi_reduction <add>, %76, %cst_23 [1] : vector<4x16x256xf32> to vector<4x256xf32>
    %c0_24 = arith.constant 0 : index
    %c0_25 = arith.constant 0 : index
    %c0_26 = arith.constant 0 : index
    %c0_27 = arith.constant 0 : index
    %78 = vector.load %arg3[%c0_24, %c0_25, %c0_26, %c0_27] : memref<1x3x4x256xf32, #tpu.memory_space<vmem>>, vector<1x1x4x256xf32>
    %79 = vector.shape_cast %78 : vector<1x1x4x256xf32> to vector<4x256xf32>
    %80 = vector.shape_cast %77 : vector<4x256xf32> to vector<1x1x4x256xf32>
    tpu.vector_store %arg3[%c0_24, %c0_25, %c0_26, %c0_27], %80 {strides = array<i32>} : memref<1x3x4x256xf32, #tpu.memory_space<vmem>>, vector<1x1x4x256xf32>,
    %81 = vector.extract_strided_slice %1 {offsets = [1, 0], sizes = [1, 256], strides = [1, 1]} : vector<3x256xf32> to vector<1x256xf32>
    %cst_28 = arith.constant 1.000000e+00 : f32
    %82 = vector.broadcast %cst_28 : f32 to vector<1x256xf32>
    %83 = arith.addf %81, %82 : vector<1x256xf32>
    %cst_29 = arith.constant 7.500000e+00 : f32
    %84 = vector.broadcast %cst_29 : f32 to vector<1x256xf32>
    %85 = arith.mulf %83, %84 : vector<1x256xf32>
    %86 = vector.extract_strided_slice %1 {offsets = [2, 0], sizes = [1, 256], strides = [1, 1]} : vector<3x256xf32> to vector<1x256xf32>
    %cst_30 = arith.constant 1.000000e+00 : f32
    %87 = vector.broadcast %cst_30 : f32 to vector<1x256xf32>
    %88 = arith.addf %86, %87 : vector<1x256xf32>
    %cst_31 = arith.constant 7.500000e+00 : f32
    %89 = vector.broadcast %cst_31 : f32 to vector<1x256xf32>
    %90 = arith.mulf %88, %89 : vector<1x256xf32>
    %91 = math.floor %85 : vector<1x256xf32>
    %92 = math.floor %90 : vector<1x256xf32>
    %93 = arith.subf %85, %91 : vector<1x256xf32>
    %94 = arith.subf %90, %92 : vector<1x256xf32>
    %95 = arith.fptosi %91 : vector<1x256xf32> to vector<1x256xi32>
    %96 = arith.fptosi %92 : vector<1x256xf32> to vector<1x256xi32>
    %c0_i32_32 = arith.constant 0 : i32
    %c15_i32_33 = arith.constant 15 : i32
    %97 = vector.broadcast %c0_i32_32 : i32 to vector<1x256xi32>
    %98 = arith.maxsi %97, %95 : vector<1x256xi32>
    %99 = vector.broadcast %c15_i32_33 : i32 to vector<1x256xi32>
    %100 = arith.minsi %99, %98 : vector<1x256xi32>
    %c1_i32_34 = arith.constant 1 : i32
    %101 = vector.broadcast %c1_i32_34 : i32 to vector<1x256xi32>
    %102 = arith.addi %95, %101 : vector<1x256xi32>
    %c0_i32_35 = arith.constant 0 : i32
    %c15_i32_36 = arith.constant 15 : i32
    %103 = vector.broadcast %c0_i32_35 : i32 to vector<1x256xi32>
    %104 = arith.maxsi %103, %102 : vector<1x256xi32>
    %105 = vector.broadcast %c15_i32_36 : i32 to vector<1x256xi32>
    %106 = arith.minsi %105, %104 : vector<1x256xi32>
    %c0_i32_37 = arith.constant 0 : i32
    %c15_i32_38 = arith.constant 15 : i32
    %107 = vector.broadcast %c0_i32_37 : i32 to vector<1x256xi32>
    %108 = arith.maxsi %107, %96 : vector<1x256xi32>
    %109 = vector.broadcast %c15_i32_38 : i32 to vector<1x256xi32>
    %110 = arith.minsi %109, %108 : vector<1x256xi32>
    %c1_i32_39 = arith.constant 1 : i32
    %111 = vector.broadcast %c1_i32_39 : i32 to vector<1x256xi32>
    %112 = arith.addi %96, %111 : vector<1x256xi32>
    %c0_i32_40 = arith.constant 0 : i32
    %c15_i32_41 = arith.constant 15 : i32
    %113 = vector.broadcast %c0_i32_40 : i32 to vector<1x256xi32>
    %114 = arith.maxsi %113, %112 : vector<1x256xi32>
    %115 = vector.broadcast %c15_i32_41 : i32 to vector<1x256xi32>
    %116 = arith.minsi %115, %114 : vector<1x256xi32>
    %117 = vector.broadcast %100 : vector<1x256xi32> to vector<16x256xi32>
    %118 = arith.cmpi eq, %2, %117 : vector<16x256xi32>
    %cst_42 = arith.constant 1.000000e+00 : f32
    %119 = vector.broadcast %cst_42 : f32 to vector<1x256xf32>
    %120 = arith.subf %119, %93 : vector<1x256xf32>
    %cst_43 = arith.constant 0.000000e+00 : f32
    %121 = vector.shape_cast %120 : vector<1x256xf32> to vector<1x256xf32>
    %122 = vector.broadcast %121 : vector<1x256xf32> to vector<16x256xf32>
    %123 = vector.broadcast %cst_43 : f32 to vector<16x256xf32>
    %124 = arith.select %118, %122, %123 : vector<16x256xi1>, vector<16x256xf32>
    %125 = vector.broadcast %106 : vector<1x256xi32> to vector<16x256xi32>
    %126 = arith.cmpi eq, %2, %125 : vector<16x256xi32>
    %cst_44 = arith.constant 0.000000e+00 : f32
    %127 = vector.shape_cast %93 : vector<1x256xf32> to vector<1x256xf32>
    %128 = vector.broadcast %127 : vector<1x256xf32> to vector<16x256xf32>
    %129 = vector.broadcast %cst_44 : f32 to vector<16x256xf32>
    %130 = arith.select %126, %128, %129 : vector<16x256xi1>, vector<16x256xf32>
    %131 = arith.addf %124, %130 : vector<16x256xf32>
    %132 = vector.broadcast %110 : vector<1x256xi32> to vector<16x256xi32>
    %133 = arith.cmpi eq, %3, %132 : vector<16x256xi32>
    %cst_45 = arith.constant 1.000000e+00 : f32
    %134 = vector.broadcast %cst_45 : f32 to vector<1x256xf32>
    %135 = arith.subf %134, %94 : vector<1x256xf32>
    %cst_46 = arith.constant 0.000000e+00 : f32
    %136 = vector.shape_cast %135 : vector<1x256xf32> to vector<1x256xf32>
    %137 = vector.broadcast %136 : vector<1x256xf32> to vector<16x256xf32>
    %138 = vector.broadcast %cst_46 : f32 to vector<16x256xf32>
    %139 = arith.select %133, %137, %138 : vector<16x256xi1>, vector<16x256xf32>
    %140 = vector.broadcast %116 : vector<1x256xi32> to vector<16x256xi32>
    %141 = arith.cmpi eq, %3, %140 : vector<16x256xi32>
    %cst_47 = arith.constant 0.000000e+00 : f32
    %142 = vector.shape_cast %94 : vector<1x256xf32> to vector<1x256xf32>
    %143 = vector.broadcast %142 : vector<1x256xf32> to vector<16x256xf32>
    %144 = vector.broadcast %cst_47 : f32 to vector<16x256xf32>
    %145 = arith.select %141, %143, %144 : vector<16x256xi1>, vector<16x256xf32>
    %146 = arith.addf %139, %145 : vector<16x256xf32>
    %c0_48 = arith.constant 0 : index
    %c1 = arith.constant 1 : index
    %c0_49 = arith.constant 0 : index
    %c0_50 = arith.constant 0 : index
    %147 = vector.load %arg2[%c0_48, %c1, %c0_49, %c0_50] : memref<1x3x64x16xf32, #tpu.memory_space<vmem>>, vector<1x1x64x16xf32>
    %148 = vector.shape_cast %147 : vector<1x1x64x16xf32> to vector<64x16xf32>
    %cst_51 = arith.constant dense<0.000000e+00> : vector<64x256xf32>
    %149 = tpu.matmul %148, %131, %cst_51 {dimension_numbers = #tpu.dot_dimension_numbers<[1], [0], [0], [1], [0, 0, 1, 1], [], []>} : vector<64x16xf32>, vector<16x256xf32>, vector<64x256xf32> -> vector<64x256xf32>
    %150 = vector.shape_cast %149 : vector<64x256xf32> to vector<4x16x256xf32>
    %151 = vector.shape_cast %146 : vector<16x256xf32> to vector<1x16x256xf32>
    %152 = vector.broadcast %151 : vector<1x16x256xf32> to vector<4x16x256xf32>
    %153 = arith.mulf %150, %152 : vector<4x16x256xf32>
    %cst_52 = arith.constant dense<0.000000e+00> : vector<4x256xf32>
    %154 = vector.multi_reduction <add>, %153, %cst_52 [1] : vector<4x16x256xf32> to vector<4x256xf32>
    %c0_53 = arith.constant 0 : index
    %c1_54 = arith.constant 1 : index
    %c0_55 = arith.constant 0 : index
    %c0_56 = arith.constant 0 : index
    %155 = vector.load %arg3[%c0_53, %c1_54, %c0_55, %c0_56] : memref<1x3x4x256xf32, #tpu.memory_space<vmem>>, vector<1x1x4x256xf32>
    %156 = vector.shape_cast %155 : vector<1x1x4x256xf32> to vector<4x256xf32>
    %157 = vector.shape_cast %154 : vector<4x256xf32> to vector<1x1x4x256xf32>
    tpu.vector_store %arg3[%c0_53, %c1_54, %c0_55, %c0_56], %157 {strides = array<i32>} : memref<1x3x4x256xf32, #tpu.memory_space<vmem>>, vector<1x1x4x256xf32>,
    %158 = vector.extract_strided_slice %1 {offsets = [2, 0], sizes = [1, 256], strides = [1, 1]} : vector<3x256xf32> to vector<1x256xf32>
    %cst_57 = arith.constant 1.000000e+00 : f32
    %159 = vector.broadcast %cst_57 : f32 to vector<1x256xf32>
    %160 = arith.addf %158, %159 : vector<1x256xf32>
    %cst_58 = arith.constant 7.500000e+00 : f32
    %161 = vector.broadcast %cst_58 : f32 to vector<1x256xf32>
    %162 = arith.mulf %160, %161 : vector<1x256xf32>
    %163 = vector.extract_strided_slice %1 {offsets = [0, 0], sizes = [1, 256], strides = [1, 1]} : vector<3x256xf32> to vector<1x256xf32>
    %cst_59 = arith.constant 1.000000e+00 : f32
    %164 = vector.broadcast %cst_59 : f32 to vector<1x256xf32>
    %165 = arith.addf %163, %164 : vector<1x256xf32>
    %cst_60 = arith.constant 7.500000e+00 : f32
    %166 = vector.broadcast %cst_60 : f32 to vector<1x256xf32>
    %167 = arith.mulf %165, %166 : vector<1x256xf32>
    %168 = math.floor %162 : vector<1x256xf32>
    %169 = math.floor %167 : vector<1x256xf32>
    %170 = arith.subf %162, %168 : vector<1x256xf32>
    %171 = arith.subf %167, %169 : vector<1x256xf32>
    %172 = arith.fptosi %168 : vector<1x256xf32> to vector<1x256xi32>
    %173 = arith.fptosi %169 : vector<1x256xf32> to vector<1x256xi32>
    %c0_i32_61 = arith.constant 0 : i32
    %c15_i32_62 = arith.constant 15 : i32
    %174 = vector.broadcast %c0_i32_61 : i32 to vector<1x256xi32>
    %175 = arith.maxsi %174, %172 : vector<1x256xi32>
    %176 = vector.broadcast %c15_i32_62 : i32 to vector<1x256xi32>
    %177 = arith.minsi %176, %175 : vector<1x256xi32>
    %c1_i32_63 = arith.constant 1 : i32
    %178 = vector.broadcast %c1_i32_63 : i32 to vector<1x256xi32>
    %179 = arith.addi %172, %178 : vector<1x256xi32>
    %c0_i32_64 = arith.constant 0 : i32
    %c15_i32_65 = arith.constant 15 : i32
    %180 = vector.broadcast %c0_i32_64 : i32 to vector<1x256xi32>
    %181 = arith.maxsi %180, %179 : vector<1x256xi32>
    %182 = vector.broadcast %c15_i32_65 : i32 to vector<1x256xi32>
    %183 = arith.minsi %182, %181 : vector<1x256xi32>
    %c0_i32_66 = arith.constant 0 : i32
    %c15_i32_67 = arith.constant 15 : i32
    %184 = vector.broadcast %c0_i32_66 : i32 to vector<1x256xi32>
    %185 = arith.maxsi %184, %173 : vector<1x256xi32>
    %186 = vector.broadcast %c15_i32_67 : i32 to vector<1x256xi32>
    %187 = arith.minsi %186, %185 : vector<1x256xi32>
    %c1_i32_68 = arith.constant 1 : i32
    %188 = vector.broadcast %c1_i32_68 : i32 to vector<1x256xi32>
    %189 = arith.addi %173, %188 : vector<1x256xi32>
    %c0_i32_69 = arith.constant 0 : i32
    %c15_i32_70 = arith.constant 15 : i32
    %190 = vector.broadcast %c0_i32_69 : i32 to vector<1x256xi32>
    %191 = arith.maxsi %190, %189 : vector<1x256xi32>
    %192 = vector.broadcast %c15_i32_70 : i32 to vector<1x256xi32>
    %193 = arith.minsi %192, %191 : vector<1x256xi32>
    %194 = vector.broadcast %177 : vector<1x256xi32> to vector<16x256xi32>
    %195 = arith.cmpi eq, %2, %194 : vector<16x256xi32>
    %cst_71 = arith.constant 1.000000e+00 : f32
    %196 = vector.broadcast %cst_71 : f32 to vector<1x256xf32>
    %197 = arith.subf %196, %170 : vector<1x256xf32>
    %cst_72 = arith.constant 0.000000e+00 : f32
    %198 = vector.shape_cast %197 : vector<1x256xf32> to vector<1x256xf32>
    %199 = vector.broadcast %198 : vector<1x256xf32> to vector<16x256xf32>
    %200 = vector.broadcast %cst_72 : f32 to vector<16x256xf32>
    %201 = arith.select %195, %199, %200 : vector<16x256xi1>, vector<16x256xf32>
    %202 = vector.broadcast %183 : vector<1x256xi32> to vector<16x256xi32>
    %203 = arith.cmpi eq, %2, %202 : vector<16x256xi32>
    %cst_73 = arith.constant 0.000000e+00 : f32
    %204 = vector.shape_cast %170 : vector<1x256xf32> to vector<1x256xf32>
    %205 = vector.broadcast %204 : vector<1x256xf32> to vector<16x256xf32>
    %206 = vector.broadcast %cst_73 : f32 to vector<16x256xf32>
    %207 = arith.select %203, %205, %206 : vector<16x256xi1>, vector<16x256xf32>
    %208 = arith.addf %201, %207 : vector<16x256xf32>
    %209 = vector.broadcast %187 : vector<1x256xi32> to vector<16x256xi32>
    %210 = arith.cmpi eq, %3, %209 : vector<16x256xi32>
    %cst_74 = arith.constant 1.000000e+00 : f32
    %211 = vector.broadcast %cst_74 : f32 to vector<1x256xf32>
    %212 = arith.subf %211, %171 : vector<1x256xf32>
    %cst_75 = arith.constant 0.000000e+00 : f32
    %213 = vector.shape_cast %212 : vector<1x256xf32> to vector<1x256xf32>
    %214 = vector.broadcast %213 : vector<1x256xf32> to vector<16x256xf32>
    %215 = vector.broadcast %cst_75 : f32 to vector<16x256xf32>
    %216 = arith.select %210, %214, %215 : vector<16x256xi1>, vector<16x256xf32>
    %217 = vector.broadcast %193 : vector<1x256xi32> to vector<16x256xi32>
    %218 = arith.cmpi eq, %3, %217 : vector<16x256xi32>
    %cst_76 = arith.constant 0.000000e+00 : f32
    %219 = vector.shape_cast %171 : vector<1x256xf32> to vector<1x256xf32>
    %220 = vector.broadcast %219 : vector<1x256xf32> to vector<16x256xf32>
    %221 = vector.broadcast %cst_76 : f32 to vector<16x256xf32>
    %222 = arith.select %218, %220, %221 : vector<16x256xi1>, vector<16x256xf32>
    %223 = arith.addf %216, %222 : vector<16x256xf32>
    %c0_77 = arith.constant 0 : index
    %c2 = arith.constant 2 : index
    %c0_78 = arith.constant 0 : index
    %c0_79 = arith.constant 0 : index
    %224 = vector.load %arg2[%c0_77, %c2, %c0_78, %c0_79] : memref<1x3x64x16xf32, #tpu.memory_space<vmem>>, vector<1x1x64x16xf32>
    %225 = vector.shape_cast %224 : vector<1x1x64x16xf32> to vector<64x16xf32>
    %cst_80 = arith.constant dense<0.000000e+00> : vector<64x256xf32>
    %226 = tpu.matmul %225, %208, %cst_80 {dimension_numbers = #tpu.dot_dimension_numbers<[1], [0], [0], [1], [0, 0, 1, 1], [], []>} : vector<64x16xf32>, vector<16x256xf32>, vector<64x256xf32> -> vector<64x256xf32>
    %227 = vector.shape_cast %226 : vector<64x256xf32> to vector<4x16x256xf32>
    %228 = vector.shape_cast %223 : vector<16x256xf32> to vector<1x16x256xf32>
    %229 = vector.broadcast %228 : vector<1x16x256xf32> to vector<4x16x256xf32>
    %230 = arith.mulf %227, %229 : vector<4x16x256xf32>
    %cst_81 = arith.constant dense<0.000000e+00> : vector<4x256xf32>
    %231 = vector.multi_reduction <add>, %230, %cst_81 [1] : vector<4x16x256xf32> to vector<4x256xf32>
    %c0_82 = arith.constant 0 : index
    %c2_83 = arith.constant 2 : index
    %c0_84 = arith.constant 0 : index
    %c0_85 = arith.constant 0 : index
    %232 = vector.load %arg3[%c0_82, %c2_83, %c0_84, %c0_85] : memref<1x3x4x256xf32, #tpu.memory_space<vmem>>, vector<1x1x4x256xf32>
    %233 = vector.shape_cast %232 : vector<1x1x4x256xf32> to vector<4x256xf32>
    %234 = vector.shape_cast %231 : vector<4x256xf32> to vector<1x1x4x256xf32>
    tpu.vector_store %arg3[%c0_82, %c2_83, %c0_84, %c0_85], %234 {strides = array<i32>} : memref<1x3x4x256xf32, #tpu.memory_space<vmem>>, vector<1x1x4x256xf32>,
    return
  }
  func.func @transform_0(%arg0: i32) -> (i32, i32, i32) {
    %c0_i32 = arith.constant 0 : i32
    %c0_i32_0 = arith.constant 0 : i32
    %c0_i32_1 = arith.constant 0 : i32
    return %c0_i32, %c0_i32_0, %arg0 : i32, i32, i32
  }
  func.func @transform_1(%arg0: i32) -> (i32, i32, i32, i32) {
    %c0_i32 = arith.constant 0 : i32
    %c0_i32_0 = arith.constant 0 : i32
    %c0_i32_1 = arith.constant 0 : i32
    %c0_i32_2 = arith.constant 0 : i32
    %c0_i32_3 = arith.constant 0 : i32
    return %c0_i32, %c0_i32_0, %c0_i32_1, %c0_i32_2 : i32, i32, i32, i32
  }
  func.func @transform_2(%arg0: i32) -> (i32, i32, i32, i32) {
    %c0_i32 = arith.constant 0 : i32
    %c0_i32_0 = arith.constant 0 : i32
    %c0_i32_1 = arith.constant 0 : i32
    %c0_i32_2 = arith.constant 0 : i32
    return %c0_i32, %c0_i32_0, %c0_i32_1, %arg0 : i32, i32, i32, i32
  }
}

</mosaic_0001>

<bundles_post_ra>
// kernel: tpu_custom_call.1
= control target key start
LH: loop header
LB: loop body
LE: loop exit
PB: predicated region body
PF: predicated region fallthrough
CT: control target
= control target key end

     0   :  { %7 = vsyncpa [#allocation3], 0  ;;  %s1645_s0 = inlined_call_operand.vmem [shape: f32[1,3,512], index: 0, kind: input, shape index: {}]   ;;  %s1646_s1 = inlined_call_operand.vmem [shape: f32[1,3,64,16], index: 1, kind: input, shape index: {}]   ;;  %s1647_s2 = inlined_call_operand.hbm [shape: f32[1,3,4,512], index: 2, kind: output, shape index: {}]  }
   0x1   :  { %9 = vsyncpa [#allocation3 + $0x1], 0  ;;  %s1223_s9 = smov 0   ;;  %s1225_s10 = smov 0  }
   0x2   :  { %s1227_s11 = smov 0   ;;  %s1229_s12 = smov 0  }
   0x3 LB: > { %s1244_s13 = sadd.s32 4294967295, %s1203_s12   ;;  %s1015_s14 = sadd.s32 4294967294, %s1203_s12   ;;  %s1203_s12 = sphi %s1229_s12, %s1653_s12   ;;  %s1199_s11 = sphi %s1227_s11, %s1652_s11   ;;  %s1195_s10 = sphi %s1225_s10, %s1651_s10   ;;  %s1191_s9 = sphi %s1223_s9, %s1650_s9  }
   0x4   : > { %s1248_s15 = sadd.s32 1, %s1203_s12   ;;  %s69_s16 = sadd.s32 1, %s1199_s11 }
   0x5   : > { %s66_s17 = ssub.s32 %s1203_s12, %s1248_s15  ;;  %p79_p0 = scmp.ne.s32.totalorder %s1199_s11, %s1195_s10 }
   0x6   : > { %p67_p1 = scmp.eq.s32.totalorder %s66_s17, 0  ;;  %p80_p2 = scmp.eq.s32.totalorder %s1244_s13, 1 }
   0x7   : > { %p85_p3 = scmp.ne.s32.totalorder %s1195_s10, %s1191_s9  ;;  %p86_p4 = scmp.eq.s32.totalorder %s1015_s14, 1 }
   0x8   : > { %s1259_s18 = scalar_select %p67_p1, %s1199_s11, %s69_s16  }
   0x9   : > { %p1261_p5 = por %p80_p2, %p79_p0  ;;  %p1265_p6 = por %p86_p4, %p85_p3 }
   0xa   : > { %p1018_p7 = scmp.ge.s32.totalorder %s1203_s12, 1  ;;  %p116_p8 = scmp.lt.s32.totalorder %s1203_s12, 3 }
   0xc   : > { %p117_p9 = pnand %p1018_p7, %p116_p8 }
   0xd   : > { %s1019_s21 = sshll.u32 (!%p117_p9), %s1244_s13, 1  ;;  %s135_s8 = sand.u32 (!%p117_p9), 1, %s1195_s10  }
   0xe   : > { %120 = sbr.rel (%p117_p9) target bundleno = 298 (0x12a), region = 28  ;;  %p139_p10 = scmp.lt.s32.totalorder (!%p117_p9), %s1019_s21, 3 }
   0xf   : > { %s1096_s14 = smul.u32 (!%p117_p9), 24, %s135_s8  ;;  %s1091_s17 = sshll.u32 (!%p117_p9), %s1244_s13, 3 }
  0x10   : > { %s949_s23 = scalar_lea.hbm (!%p117_p9), %s1647_s2, %s1091_s17  ;;  %s1161_s30 = scalar_lea.hbm (!%p117_p9), %s1647_s2, 48 }
  0x11   : > { %s1553_s16 = scalar_lea.vmem (!%p117_p9), [#allocation2], %s1096_s14  ;;  %s952_s24 = sshll.u32 (!%p117_p9), %s949_s23, 4  ;;  %s953_s24 = int_to_ptr.hbm [resolvable:$true] %s952_s24 }
  0x12   : > { %s950_s13 = sshll.u32 (!%p117_p9), %s1553_s16, 4  ;;  %s1155_s26 = sshra.s32 (!%p117_p9), %s953_s24, 4  ;;  %s951_s13 = int_to_ptr.vmem [resolvable:$true] %s950_s13  ;;  %s1156_s26 = int_to_ptr.hbm [resolvable:$true] %s1155_s26 }
  0x13   : > { %s1655_s21 = smov (!%p139_p10, %s1019_s21), 3  ;;  %v146_v1 = vlaneseq  ;;  %vm254_vm4 = vcmask 130048   ;;  %v246_v56 = vld [vmem:[%s1646_s1] sm:$0xff]  ;;  %s1157_s27 = scalar_lea.hbm %s1156_s26, 24 }
  0x14   : > { %s1020_s22 = sshll.u32 %s1655_s21, 2  ;;  %v250_v57 = vld [vmem:[%s1646_s1 + $0x20] sm:$0xff]  ;;  %p1158_p11 = scmp.ne.s32.totalorder %s1156_s26, %s1157_s27 }
  0x15   : > { %s142_s25 = scalar_lea.vmem %s1645_s0, %s1020_s22  ;;  %v1275_v4 = vshrl.u32 %v146_v1, 7  ;;  %p1162_p0 = scmp.lt.s32.totalorder %s1156_s26, %s1647_s2 }
  0x16   : > { %v145_v0 = vld [vmem:[%s142_s25] sm:$0x77]  ;;  %s938_s25 = scalar_lea.sflag [#allocation3], %s135_s8  ;;  %p1159_p12 = pnand %p1158_p11, %p1261_p5 }
  0x17   : > { %v149_v2 = vadd.f32 1.0, %v145_v0  ;;  %v1280_v8 = vadd.s32 8, %v1275_v4  ;;  %p1163_p1 = scmp.lt.s32.totalorder %s1161_s30, %s1157_s27 }
  0x18   : > { %p1160_p13 = pneg %p1159_p12 }
  0x19   : > { %v150_v3 = vmul.f32 7.5, %v149_v2  ;;  %p1164_p2 = por %p1163_p1, %p1162_p0 }
  0x1b   : > { %v151_v5 = vfloor.f32 %v150_v3  ;;  %p1165_p3 = pnand %p1164_p2, %p1160_p13 }
  0x1d   : > { %v1277_v6 = vsub.f32 %v150_v3, %v151_v5  ;;  %v1098_v7 = vcvt.f32.s32 %v151_v5 }
  0x1f   : > { %vm154_vm0 = vcmp.gt.s32.totalorder %v1098_v7, 0  ;;  %v158_v9 = vadd.s32 1, %v1098_v7  ;;  %v1283_v10 = vsub.f32 1.0, %v1277_v6  ;;  %v192_v11 = vperm.slane %v1277_v6, 0 }
  0x20   : > { %v155_v12 = vsel %vm154_vm0, %v1098_v7, 0  ;;  %v193_v13 = vperm.slane %v1277_v6, 4  ;;  %v233_v14 = vperm.slane %v1277_v6, 5  ;;  %v232_v15 = vperm.slane %v1277_v6, 1 }
  0x21   : > { %vm156_vm1 = vcmp.lt.s32.totalorder %v155_v12, 15  ;;  %vm159_vm2 = vcmp.gt.s32.totalorder %v158_v9, 0  ;;  %v173_v16 = vperm.slane %v1283_v10, 0  ;;  %v196_v17 = vperm.slane %v192_v11, 0 }
  0x22   : > { %v1290_v18 = vsel %vm156_vm1, %v155_v12, 15  ;;  %v160_v19 = vsel %vm159_vm2, %v158_v9, 0  ;;  %v174_v20 = vperm.slane %v1283_v10, 4  ;;  %v197_v21 = vperm.slane %v193_v13, 0 }
  0x23   : > { %vm161_vm3 = vcmp.lt.s32.totalorder %v160_v19, 15  ;;  %v163_v22 = vperm.slane %v1290_v18, 0  ;;  %v177_v23 = vperm.slane %v173_v16, 0  ;;  %v164_v24 = vperm.slane %v1290_v18, 4 }
  0x24   : > { %v1295_v25 = vsel %vm161_vm3, %v160_v19, 15  ;;  %v178_v26 = vperm.slane %v174_v20, 0  ;;  %v207_v27 = vperm.slane %v1290_v18, 5  ;;  %v215_v28 = vperm.slane %v1283_v10, 5 }
  0x25   : > { %v165_v29 = vperm.slane %v163_v22, 0  ;;  %v183_v30 = vperm.slane %v1295_v25, 0  ;;  %v166_v31 = vperm.slane %v164_v24, 0  ;;  %v184_v32 = vperm.slane %v1295_v25, 4 }
  0x26   : > { %v1301_v33 = vperm.slane %v207_v27, 1  ;;  %v1303_v34 = vperm.slane %v215_v28, 1  ;;  %v225_v35 = vperm.slane %v1295_v25, 5  ;;  %v1306_v36 = vperm.slane %v233_v14, 1 }
  0x27   : > { %vm169_vm5 = vcmp.eq.s32.totalorder %v1280_v8, %v165_v29  ;;  %v185_v37 = vperm.slane %v183_v30, 0  ;;  %vm170_vm6 = vcmp.eq.s32.totalorder %v1280_v8, %v166_v31  ;;  %v186_v38 = vperm.slane %v184_v32, 0 }
  0x28   : > { %v181_v39 = vsel %vm169_vm5, %v177_v23, 0.0  ;;  %v182_v40 = vsel %vm170_vm6, %v178_v26, 0.0  ;;  %vm167_vm7 = vcmp.eq.s32.totalorder %v1275_v4, %v165_v29  ;;  %vm168_vm8 = vcmp.eq.s32.totalorder %v1275_v4, %v166_v31 }
  0x29   : > { %vm189_vm9 = vcmp.eq.s32.totalorder %v1280_v8, %v185_v37  ;;  %vm190_vm10 = vcmp.eq.s32.totalorder %v1280_v8, %v186_v38  ;;  %v179_v41 = vsel %vm167_vm7, %v177_v23, 0.0  ;;  %vm187_vm11 = vcmp.eq.s32.totalorder %v1275_v4, %v185_v37 }
  0x2a   : > { %v200_v42 = vsel %vm189_vm9, %v196_v17, 0.0  ;;  %v201_v43 = vsel %vm190_vm10, %v197_v21, 0.0  ;;  %v198_v44 = vsel %vm187_vm11, %v196_v17, 0.0  ;;  %v180_v45 = vsel %vm168_vm8, %v178_v26, 0.0 }
  0x2b   : > { %v1315_v46 = vadd.f32 %v200_v42, %v181_v39  ;;  %v1317_v47 = vadd.f32 %v201_v43, %v182_v40  ;;  %v1319_v48 = vadd.f32 %v198_v44, %v179_v41  ;;  %vm188_vm12 = vcmp.eq.s32.totalorder %v1275_v4, %v186_v38  ;;  %v248_v40 = vld [vmem:[%s1646_s1 + $0x10] sm:$0xff]  ;;  %v253_v42 = vld [vmem:[%s1646_s1 + $0x38] sm:$0xff]  ;;  %v1037_v43 = vld [vmem:[%s1646_s1 + $0x40] sm:$0xff] }
  0x2c   : > { %v199_v49 = vsel %vm188_vm12, %v197_v21, 0.0  ;;  %vm213_vm13 = vcmp.eq.s32.totalorder %v1280_v8, %v1301_v33  ;;  %v1324_v50 = vperm.slane %v225_v35, 1  ;;  %v206_v51 = vperm.slane %v1290_v18, 1  ;;  %v252_v41 = vld [vmem:[%s1646_s1 + $0x30] sm:$0xff]  ;;  %v1062_v44 = vld [vmem:[%s1646_s1 + $0x80] sm:$0xff] }
  0x2d   : > { %293 = vmatpush.msra.mxu0 %v1315_v46  ;;  %1092 = vmatpush.msra.mxu2 %v1315_v46  ;;  %v1329_v52 = vadd.f32 %v199_v49, %v180_v45  ;;  %v223_v53 = vsel %vm213_vm13, %v1303_v34, 0.0  ;;  %v214_v54 = vperm.slane %v1283_v10, 1  ;;  %v224_v55 = vperm.slane %v1295_v25, 1  ;;  %v1038_v45 = vld [vmem:[%s1646_s1 + $0x48] sm:$0xff] }
  0x2e   : > { %334 = vmatpush.msra.mxu1 %v1317_v47  ;;  %1094 = vmatpush.msra.mxu3 %v1317_v47  ;;  %vm231_vm14 = vcmp.eq.s32.totalorder %v1280_v8, %v1324_v50  ;;  %v208_v58 = vperm.slane %v206_v51, 1  ;;  %v236_v59 = vperm.slane %v232_v15, 1  ;;  %v468_v60 = vperm.slane %v1290_v18, 6  ;;  %v1063_v49 = vld [vmem:[%s1646_s1 + $0x88] sm:$0xff]  ;;  %v1064_v51 = vld [vmem:[%s1646_s1 + $0x90] sm:$0xff] }
  0x2f   : > { %294 = vmatpush.msra.mxu0 %v1319_v48  ;;  %1093 = vmatpush.msra.mxu2 %v1319_v48  ;;  %v241_v61 = vsel %vm231_vm14, %v1306_v36, 0.0  ;;  %v218_v62 = vperm.slane %v214_v54, 1  ;;  %v226_v63 = vperm.slane %v224_v55, 1  ;;  %v476_v0 = vperm.slane %v1283_v10, 6  ;;  %v1065_v54 = vld [vmem:[%s1646_s1 + $0x98] sm:$0xff]  ;;  %v1041_v55 = vld [vmem:[%s1646_s1 + $0x60] sm:$0xff] }
  0x30   : > { %335 = vmatpush.msra.mxu1 %v1329_v52  ;;  %1095 = vmatpush.msra.mxu3 %v1329_v52  ;;  %v1351_v1 = vadd.f32 %v241_v61, %v223_v53  ;;  %vm212_vm15 = vcmp.eq.s32.totalorder %v1280_v8, %v208_v58  ;;  %v470_v2 = vperm.slane %v468_v60, 2  ;;  %v486_v3 = vperm.slane %v1295_v25, 6  ;;  %v1040_v53 = vld [vmem:[%s1646_s1 + $0x58] sm:$0xff]  ;;  %v1068_v60 = vld [vmem:[%s1646_s1 + $0xb0] sm:$0xff] }
  0x31   : > { %1021 = vmatmul.msk.f32.vlgmr.msra.gmra.mxu0 %vm254_vm4, %v246_v56  ;;  %1025 = vmatmul.msk.f32.vlgmr.msra.gmra.mxu2 %vm254_vm4, %v250_v57  ;;  %v222_v5 = vsel %vm212_vm15, %v218_v62, 0.0  ;;  %vm230_vm0 = vcmp.eq.s32.totalorder %v1280_v8, %v226_v63  ;;  %v480_v7 = vperm.slane %v476_v0, 2  ;;  %v494_v9 = vperm.slane %v1277_v6, 6  ;;  %v1044_v61 = vld [vmem:[%s1646_s1 + $0x78] sm:$0xff] }
  0x32   : > { %1029 = vmatmul.msk.f32.vlgmr.msra.gmra.mxu1 %vm254_vm4, %v246_v56  ;;  %1033 = vmatmul.msk.f32.vlgmr.msra.gmra.mxu3 %vm254_vm4, %v250_v57  ;;  %v240_v11 = vsel %vm230_vm0, %v236_v59, 0.0  ;;  %vm474_vm1 = vcmp.eq.s32.totalorder %v1280_v8, %v470_v2  ;;  %v488_v12 = vperm.slane %v486_v3, 2  ;;  %v467_v13 = vperm.slane %v1290_v18, 2  ;;  %v1066_v56 = vld [vmem:[%s1646_s1 + $0xa0] sm:$0xff]  ;;  %v1042_v57 = vld [vmem:[%s1646_s1 + $0x68] sm:$0xff] }
  0x33   : > { %595 = vmatpush.msrb.mxu3 %v1351_v1  ;;  %v1364_v14 = vadd.f32 %v240_v11, %v222_v5  ;;  %v484_v15 = vsel %vm474_vm1, %v480_v7, 0.0  ;;  %v498_v16 = vperm.slane %v494_v9, 2  ;;  %v475_v17 = vperm.slane %v1283_v10, 2  ;;  %v247_v10 = vld [vmem:[%s1646_s1 + $0x8] sm:$0xff] }
  0x34   : > { %vm492_vm2 = vcmp.eq.s32.totalorder %v1280_v8, %v488_v12  ;;  %v469_v19 = vperm.slane %v467_v13, 2  ;;  %v485_v20 = vperm.slane %v1295_v25, 2  ;;  %v493_v21 = vperm.slane %v1277_v6, 2  ;;  %v251_v6 = vld [vmem:[%s1646_s1 + $0x28] sm:$0xff] }
  0x35   : > { %554 = vmatpush.msrb.mxu2 %v1364_v14  ;;  %v502_v22 = vsel %vm492_vm2, %v498_v16, 0.0  ;;  %v479_v23 = vperm.slane %v475_v17, 2  ;;  %vm211_vm3 = vcmp.eq.s32.totalorder %v1275_v4, %v1301_v33  ;;  %vm229_vm5 = vcmp.eq.s32.totalorder %v1275_v4, %v1324_v50  ;;  %v1039_v50 = vld [vmem:[%s1646_s1 + $0x50] sm:$0xff] }
  0x36   : > { %v1375_v18 = vadd.f32 %v502_v22, %v484_v15  ;;  %vm473_vm6 = vcmp.eq.s32.totalorder %v1280_v8, %v469_v19  ;;  %v487_v24 = vperm.slane %v485_v20, 2  ;;  %v497_v25 = vperm.slane %v493_v21, 2 }
  0x37   : > { %v483_v26 = vsel %vm473_vm6, %v479_v23, 0.0  ;;  %v221_v27 = vsel %vm211_vm3, %v1303_v34, 0.0  ;;  %v239_v28 = vsel %vm229_vm5, %v1306_v36, 0.0  ;;  %vm210_vm7 = vcmp.eq.s32.totalorder %v1275_v4, %v208_v58  ;;  %v1067_v58 = vld [vmem:[%s1646_s1 + $0xa8] sm:$0xff] }
  0x38   : > { %810 = vmatpush.msrb.mxu1 %v1375_v18  ;;  %vm491_vm8 = vcmp.eq.s32.totalorder %v1280_v8, %v487_v24  ;;  %v1389_v29 = vadd.f32 %v239_v28, %v221_v27  ;;  %v220_v30 = vsel %vm210_vm7, %v218_v62, 0.0  ;;  %vm228_vm9 = vcmp.eq.s32.totalorder %v1275_v4, %v226_v63  ;;  %v1069_v62 = vld [vmem:[%s1646_s1 + $0xb8] sm:$0xff] }
  0x39   : > { %1022 = vmatmul.msk.f32.gmra.mxu0 %vm254_vm4, %v247_v10  ;;  %1026 = vmatmul.msk.f32.gmra.mxu2 %vm254_vm4, %v251_v6  ;;  %v501_v31 = vsel %vm491_vm8, %v497_v25, 0.0  ;;  %v238_v32 = vsel %vm228_vm9, %v236_v59, 0.0  ;;  %vm472_vm10 = vcmp.eq.s32.totalorder %v1275_v4, %v470_v2  ;;  %vm490_vm11 = vcmp.eq.s32.totalorder %v1275_v4, %v488_v12  ;;  %v1043_v59 = vld [vmem:[%s1646_s1 + $0x70] sm:$0xff] }
  0x3a   : > { %1030 = vmatmul.msk.f32.gmra.mxu1 %vm254_vm4, %v247_v10  ;;  %1034 = vmatmul.msk.f32.gmra.mxu3 %vm254_vm4, %v251_v6  ;;  %v1398_v8 = vadd.f32 %v501_v31, %v483_v26  ;;  %v1400_v33 = vadd.f32 %v238_v32, %v220_v30  ;;  %v482_v34 = vsel %vm472_vm10, %v480_v7, 0.0  ;;  %v500_v35 = vsel %vm490_vm11, %v498_v16, 0.0 }
  0x3b   : > { %596 = vmatpush.msrb.mxu3 %v1389_v29  ;;  %v1403_v36 = vadd.f32 %v500_v35, %v482_v34  ;;  %vm471_vm12 = vcmp.eq.s32.totalorder %v1275_v4, %v469_v19  ;;  %vm489_vm13 = vcmp.eq.s32.totalorder %v1275_v4, %v487_v24  ;;  %v249_v4 = vld [vmem:[%s1646_s1 + $0x18] sm:$0xff]  ;;  %vm451_vm14 = vcmask 1041409  }
  0x3c   : > { %769 = vmatpush.msrb.mxu0 %v1398_v8  ;;  %555 = vmatpush.msrb.mxu2 %v1400_v33  ;;  %v481_v37 = vsel %vm471_vm12, %v479_v23, 0.0  ;;  %v499_v38 = vsel %vm489_vm13, %v497_v25, 0.0  ;;  %vm453_vm15 = vcmask 1045509   ;;  %vm456_vm0 = vcmask 1042434  }
  0x3d   : > { %811 = vmatpush.msrb.mxu1 %v1403_v36  ;;  %v1410_v39 = vadd.f32 %v499_v38, %v481_v37  ;;  %vm458_vm1 = vcmask 1046534   ;;  %vm461_vm2 = vcmask 1043459   ;;  %vm463_vm3 = vcmask 1047559  }
  0x3f   : > { %770 = vmatpush.msrb.mxu0 %v1410_v39 }
  0x41   : > { %1023 = vmatmul.msk.f32.gmra.mxu0 %vm254_vm4, %v248_v40  ;;  %1027 = vmatmul.msk.f32.gmra.mxu2 %vm254_vm4, %v252_v41 }
  0x42   : > { %1031 = vmatmul.msk.f32.gmra.mxu1 %vm254_vm4, %v248_v40  ;;  %1035 = vmatmul.msk.f32.gmra.mxu3 %vm254_vm4, %v252_v41 }
  0x49   : > { %1024 = vmatmul.msk.f32.gmra.mxu0 %vm254_vm4, %v249_v4  ;;  %1028 = vmatmul.msk.f32.gmra.mxu2 %vm254_vm4, %v253_v42 }
  0x4a   : > { %1032 = vmatmul.msk.f32.gmra.mxu1 %vm254_vm4, %v249_v4  ;;  %1036 = vmatmul.msk.f32.gmra.mxu3 %vm254_vm4, %v253_v42 }
  0x51   : > { %1045 = vmatmul.msk.f32.vlgmr.msrb.gmra.mxu2 %vm254_vm4, %v1037_v43  ;;  %1070 = vmatmul.msk.f32.vlgmr.msrb.gmra.mxu0 %vm254_vm4, %v1062_v44 }
  0x52   : > { %1053 = vmatmul.msk.f32.vlgmr.msrb.gmra.mxu3 %vm254_vm4, %v1037_v43  ;;  %1078 = vmatmul.msk.f32.vlgmr.msrb.gmra.mxu1 %vm254_vm4, %v1062_v44 }
  0x59   : > { %1046 = vmatmul.msk.f32.gmra.mxu2 %vm254_vm4, %v1038_v45  ;;  %1071 = vmatmul.msk.f32.gmra.mxu0 %vm254_vm4, %v1063_v49 }
  0x5a   : > { %1054 = vmatmul.msk.f32.gmra.mxu3 %vm254_vm4, %v1038_v45  ;;  %1079 = vmatmul.msk.f32.gmra.mxu1 %vm254_vm4, %v1063_v49 }
  0x61   : > { %1047 = vmatmul.msk.f32.gmra.mxu2 %vm254_vm4, %v1039_v50  ;;  %1072 = vmatmul.msk.f32.gmra.mxu0 %vm254_vm4, %v1064_v51 }
  0x62   : > { %1055 = vmatmul.msk.f32.gmra.mxu3 %vm254_vm4, %v1039_v50  ;;  %1080 = vmatmul.msk.f32.gmra.mxu1 %vm254_vm4, %v1064_v51 }
  0x69   : > { %1048 = vmatmul.msk.f32.gmra.mxu2 %vm254_vm4, %v1040_v53  ;;  %1073 = vmatmul.msk.f32.gmra.mxu0 %vm254_vm4, %v1065_v54 }
  0x6a   : > { %1056 = vmatmul.msk.f32.gmra.mxu3 %vm254_vm4, %v1040_v53  ;;  %1081 = vmatmul.msk.f32.gmra.mxu1 %vm254_vm4, %v1065_v54 }
  0x71   : > { %1049 = vmatmul.msk.f32.gmra.mxu2 %vm254_vm4, %v1041_v55  ;;  %1074 = vmatmul.msk.f32.gmra.mxu0 %vm254_vm4, %v1066_v56 }
  0x72   : > { %1057 = vmatmul.msk.f32.gmra.mxu3 %vm254_vm4, %v1041_v55  ;;  %1082 = vmatmul.msk.f32.gmra.mxu1 %vm254_vm4, %v1066_v56 }
  0x79   : > { %1050 = vmatmul.msk.f32.gmra.mxu2 %vm254_vm4, %v1042_v57  ;;  %1075 = vmatmul.msk.f32.gmra.mxu0 %vm254_vm4, %v1067_v58 }
  0x7a   : > { %1058 = vmatmul.msk.f32.gmra.mxu3 %vm254_vm4, %v1042_v57  ;;  %1083 = vmatmul.msk.f32.gmra.mxu1 %vm254_vm4, %v1067_v58 }
  0x81   : > { %1051 = vmatmul.msk.f32.gmra.mxu2 %vm254_vm4, %v1043_v59  ;;  %1076 = vmatmul.msk.f32.gmra.mxu0 %vm254_vm4, %v1068_v60 }
  0x82   : > { %1059 = vmatmul.msk.f32.gmra.mxu3 %vm254_vm4, %v1043_v59  ;;  %1084 = vmatmul.msk.f32.gmra.mxu1 %vm254_vm4, %v1068_v60 }
  0x89   : > { %1052 = vmatmul.msk.f32.gmra.mxu2 %vm254_vm4, %v1044_v61  ;;  %1077 = vmatmul.msk.f32.gmra.mxu0 %vm254_vm4, %v1069_v62 }
  0x8a   : > { %1060 = vmatmul.msk.f32.gmra.mxu3 %vm254_vm4, %v1044_v61  ;;  %1085 = vmatmul.msk.f32.gmra.mxu1 %vm254_vm4, %v1069_v62  ;;  %vm445_vm4 = vcmask 1043456  }
  0xae   : > { %v296_v63 = vpop.f32.mrf.mxu0 }
  0xaf   : > { %v337_v0 = vpop.f32.mrf.mxu1  ;;  %v361_v15 = vmul.f32 %v296_v63, %v1400_v33 }
  0xb0   : > { %v362_v11 = vmul.f32 %v337_v0, %v1389_v29 }
  0xb4   : > { %v308_v2 = vpop.f32.mrf.mxu2 }
  0xb5   : > { %v349_v3 = vpop.f32.mrf.mxu3  ;;  %v369_v20 = vmul.f32 %v308_v2, %v1400_v33 }
  0xb6   : > { %v299_v5 = vpop.f32.mrf.mxu0  ;;  %v370_v21 = vmul.f32 %v349_v3, %v1389_v29 }
  0xb7   : > { %v340_v7 = vpop.f32.mrf.mxu1  ;;  %v363_v16 = vmul.f32 %v299_v5, %v1364_v14 }
  0xb8   : > { %v364_v9 = vmul.f32 %v340_v7, %v1351_v1 }
  0xb9   : > { %v377_v26 = vadd.f32 %v363_v16, %v361_v15 }
  0xba   : > { %v384_v12 = vadd.f32 %v364_v9, %v362_v11 }
  0xbb   : > { %v378_v34 = vrot.slane %v377_v26, 4 }
  0xbc   : > { %v311_v13 = vpop.f32.mrf.mxu2  ;;  %v385_v10 = vrot.slane %v384_v12, 4 }
  0xbd   : > { %v371_v17 = vmul.f32 %v311_v13, %v1364_v14  ;;  %v352_v19 = vpop.f32.mrf.mxu3  ;;  %v379_v49 = vadd.f32 %v378_v34, %v377_v26 }
  0xbe   : > { %v372_v22 = vmul.f32 %v352_v19, %v1351_v1  ;;  %v302_v23 = vpop.f32.mrf.mxu0  ;;  %v386_v28 = vadd.f32 %v385_v10, %v384_v12 }
  0xbf   : > { %v343_v6 = vpop.f32.mrf.mxu1  ;;  %v405_v24 = vadd.f32 %v371_v17, %v369_v20  ;;  %v365_v35 = vmul.f32 %v302_v23, %v1400_v33  ;;  %v380_v59 = vrot.slane %v379_v49, 2 }
  0xc0   : > { %v412_v25 = vadd.f32 %v372_v22, %v370_v21  ;;  %v387_v41 = vrot.slane %v386_v28, 2  ;;  %v366_v44 = vmul.f32 %v343_v6, %v1389_v29 }
  0xc1   : > { %v406_v30 = vrot.slane %v405_v24, 4  ;;  %v381_v17 = vadd.f32 %v380_v59, %v379_v49 }
  0xc2   : > { %v413_v27 = vrot.slane %v412_v25, 4  ;;  %v388_v54 = vadd.f32 %v387_v41, %v386_v28 }
  0xc3   : > { %v407_v43 = vadd.f32 %v406_v30, %v405_v24  ;;  %v382_v26 = vrot.slane %v381_v17, 1 }
  0xc4   : > { %v414_v31 = vadd.f32 %v413_v27, %v412_v25  ;;  %v314_v32 = vpop.f32.mrf.mxu2  ;;  %v389_v9 = vrot.slane %v388_v54, 1 }
  0xc5   : > { %v355_v37 = vpop.f32.mrf.mxu3  ;;  %v408_v56 = vrot.slane %v407_v43, 2  ;;  %v373_v60 = vmul.f32 %v314_v32, %v1400_v33 }
  0xc6   : > { %v415_v38 = vrot.slane %v414_v31, 2  ;;  %v305_v40 = vpop.f32.mrf.mxu0  ;;  %v374_v2 = vmul.f32 %v355_v37, %v1389_v29  ;;  %v390_v29 = vadd.f32 %v389_v9, %v388_v54 }
  0xc7   : > { %v367_v4 = vmul.f32 %v305_v40, %v1364_v14  ;;  %v346_v42 = vpop.f32.mrf.mxu1  ;;  %v409_v15 = vadd.f32 %v408_v56, %v407_v43  ;;  %v383_v43 = vadd.f32 %v382_v26, %v381_v17 }
  0xc8   : > { %v368_v45 = vmul.f32 %v346_v42, %v1351_v1  ;;  %v416_v51 = vadd.f32 %v415_v38, %v414_v31 }
  0xc9   : > { %v391_v50 = vadd.f32 %v367_v4, %v365_v35  ;;  %v410_v10 = vrot.slane %v409_v15, 1  ;;  %v441_v35 = vrot.slane %v390_v29, 4 }
  0xca   : > { %v398_v53 = vadd.f32 %v368_v45, %v366_v44  ;;  %v417_v0 = vrot.slane %v416_v51, 1 }
  0xcb   : > { %v392_v55 = vrot.slane %v391_v50, 4  ;;  %v411_v40 = vadd.f32 %v410_v10, %v409_v15 }
  0xcc   : > { %v399_v57 = vrot.slane %v398_v53, 4  ;;  %v317_v58 = vpop.f32.mrf.mxu2  ;;  %v418_v20 = vadd.f32 %v417_v0, %v416_v51 }
  0xcd   : > { %v393_v61 = vadd.f32 %v392_v55, %v391_v50  ;;  %v375_v62 = vmul.f32 %v317_v58, %v1364_v14  ;;  %v358_v63 = vpop.f32.mrf.mxu3 }
  0xce   : > { %v400_v3 = vadd.f32 %v399_v57, %v398_v53  ;;  %v376_v5 = vmul.f32 %v358_v63, %v1351_v1  ;;  %v1529_v7 = vpop.f32.mrf.mxu0  ;;  %v443_v30 = vrot.slane %v418_v20, 4  ;;  %v446_v53 = vsel %vm445_vm4, %v383_v43, %v441_v35 }
  0xcf   : > { %v394_v11 = vrot.slane %v393_v61, 2  ;;  %v419_v12 = vadd.f32 %v375_v62, %v373_v60  ;;  %v1531_v13 = vpop.f32.mrf.mxu1  ;;  %v837_v26 = vmul.f32 %v1529_v7, %v1319_v48 }
  0xd0   : > { %v401_v16 = vrot.slane %v400_v3, 2  ;;  %v426_v33 = vadd.f32 %v376_v5, %v374_v2  ;;  %v448_v44 = vsel %vm445_vm4, %v411_v40, %v443_v30 }
  0xd1   : > { %v395_v19 = vadd.f32 %v394_v11, %v393_v61  ;;  %v420_v14 = vrot.slane %v419_v12, 4  ;;  %v455_v56 = vrot.slane %v448_v44, 6 }
  0xd2   : > { %v402_v21 = vadd.f32 %v401_v16, %v400_v3  ;;  %v427_v22 = vrot.slane %v426_v33, 4 }
  0xd3   : > { %v421_v23 = vadd.f32 %v420_v14, %v419_v12  ;;  %v396_v1 = vrot.slane %v395_v19, 1 }
  0xd4   : > { %v403_v6 = vrot.slane %v402_v21, 1  ;;  %v428_v24 = vadd.f32 %v427_v22, %v426_v33  ;;  %v557_v25 = vpop.f32.mrf.mxu2 }
  0xd5   : > { %v422_v27 = vrot.slane %v421_v23, 2  ;;  %v598_v28 = vpop.f32.mrf.mxu3  ;;  %v397_v41 = vadd.f32 %v396_v1, %v395_v19  ;;  %v622_v14 = vmul.f32 %v557_v25, %v1410_v39 }
  0xd6   : > { %v404_v31 = vadd.f32 %v403_v6, %v402_v21  ;;  %v429_v32 = vrot.slane %v428_v24, 2  ;;  %v1533_v34 = vpop.f32.mrf.mxu0  ;;  %v623_v58 = vmul.f32 %v598_v28, %v1403_v36 }
  0xd7   : > { %v423_v37 = vadd.f32 %v422_v27, %v421_v23  ;;  %v1535_v38 = vpop.f32.mrf.mxu1 }
  0xd8   : > { %v442_v4 = vrot.slane %v404_v31, 4  ;;  %v430_v42 = vadd.f32 %v429_v32, %v428_v24  ;;  %v840_v40 = vmul.f32 %v1535_v38, %v1317_v47 }
  0xd9   : > { %v424_v49 = vrot.slane %v423_v37, 1 }
  0xda   : > { %v447_v45 = vsel %vm445_vm4, %v397_v41, %v442_v4  ;;  %v431_v50 = vrot.slane %v430_v42, 1 }
  0xdb   : > { %v450_v51 = vrot.slane %v447_v45, 7  ;;  %v425_v61 = vadd.f32 %v424_v49, %v423_v37  ;;  %v839_v37 = vmul.f32 %v1533_v34, %v1315_v46  ;;  %v838_v49 = vmul.f32 %v1531_v13, %v1329_v52 }
  0xdc   : > { %v432_v54 = vadd.f32 %v431_v50, %v430_v42  ;;  %v560_v55 = vpop.f32.mrf.mxu2 }
  0xdd   : > { %v452_v57 = vsel %vm451_vm14, %v450_v51, %v446_v53  ;;  %v601_v59 = vpop.f32.mrf.mxu3  ;;  %v624_v16 = vmul.f32 %v560_v55, %v1398_v8  ;;  %v853_v34 = vadd.f32 %v839_v37, %v837_v26  ;;  %v860_v55 = vadd.f32 %v840_v40, %v838_v49 }
  0xde   : > { %v454_v60 = vsel %vm453_vm15, %v450_v51, %v452_v57  ;;  %v444_v62 = vrot.slane %v432_v54, 4  ;;  %v625_v63 = vmul.f32 %v601_v59, %v1375_v18  ;;  %v778_v0 = vpop.f32.mrf.mxu0 }
  0xdf   : > { %v457_v2 = vsel %vm456_vm0, %v455_v56, %v454_v60  ;;  %v819_v3 = vpop.f32.mrf.mxu1  ;;  %v638_v22 = vadd.f32 %v624_v16, %v622_v14  ;;  %v841_v30 = vmul.f32 %v778_v0, %v1319_v48  ;;  %v861_v13 = vrot.slane %v860_v55, 4 }
  0xe0   : > { %v449_v5 = vsel %vm445_vm4, %v425_v61, %v444_v62  ;;  %v645_v9 = vadd.f32 %v625_v63, %v623_v58  ;;  %v459_v12 = vsel %vm458_vm1, %v455_v56, %v457_v2  ;;  %v842_v1 = vmul.f32 %v819_v3, %v1329_v52 }
  0xe1   : > { %v460_v11 = vrot.slane %v449_v5, 5  ;;  %v639_v6 = vrot.slane %v638_v22, 4  ;;  %v854_v3 = vrot.slane %v853_v34, 4 }
  0xe2   : > { %v646_v17 = vrot.slane %v645_v9, 4 }
  0xe3   : > { %v462_v15 = vsel %vm461_vm2, %v460_v11, %v459_v12  ;;  %v640_v42 = vadd.f32 %v639_v6, %v638_v22  ;;  %v862_v6 = vadd.f32 %v861_v13, %v860_v55 }
  0xe4   : > { %v464_v33 = vsel %vm463_vm3, %v460_v11, %v462_v15  ;;  %v563_v19 = vpop.f32.mrf.mxu2  ;;  %v647_v23 = vadd.f32 %v646_v17, %v645_v9 }
  0xe5   : > { %466 = vst [vmem:[%s1553_s16] sm:$0xff] %v464_v33  ;;  %v604_v20 = vpop.f32.mrf.mxu3  ;;  %v626_v25 = vmul.f32 %v563_v19, %v1410_v39  ;;  %v641_v38 = vrot.slane %v640_v42, 2 }
  0xe6   : > { %v781_v21 = vpop.f32.mrf.mxu0  ;;  %v648_v27 = vrot.slane %v647_v23, 2  ;;  %v627_v41 = vmul.f32 %v604_v20, %v1403_v36 }
  0xe7   : > { %v822_v29 = vpop.f32.mrf.mxu1  ;;  %v843_v31 = vmul.f32 %v781_v21, %v1315_v46  ;;  %v642_v11 = vadd.f32 %v641_v38, %v640_v42 }
  0xe8   : > { %v844_v10 = vmul.f32 %v822_v29, %v1317_v47  ;;  %v649_v50 = vadd.f32 %v648_v27, %v647_v23 }
  0xe9   : > { %v867_v53 = vadd.f32 %v843_v31, %v841_v30 }
  0xea   : > { %v874_v24 = vadd.f32 %v844_v10, %v842_v1  ;;  %v650_v59 = vrot.slane %v649_v50, 1  ;;  %v855_v1 = vadd.f32 %v854_v3, %v853_v34 }
  0xeb   : > { %v868_v62 = vrot.slane %v867_v53, 4 }
  0xec   : > { %v566_v28 = vpop.f32.mrf.mxu2  ;;  %v875_v43 = vrot.slane %v874_v24, 4  ;;  %v651_v17 = vadd.f32 %v650_v59, %v649_v50  ;;  %v856_v59 = vrot.slane %v855_v1, 2 }
  0xed   : > { %v628_v32 = vmul.f32 %v566_v28, %v1398_v8  ;;  %v607_v35 = vpop.f32.mrf.mxu3  ;;  %v869_v21 = vadd.f32 %v868_v62, %v867_v53 }
  0xee   : > { %v629_v7 = vmul.f32 %v607_v35, %v1375_v18  ;;  %v784_v4 = vpop.f32.mrf.mxu0  ;;  %v876_v57 = vadd.f32 %v875_v43, %v874_v24  ;;  %v643_v24 = vrot.slane %v642_v11, 1  ;;  %v702_v27 = vrot.slane %v651_v17, 4 }
  0xef   : > { %v652_v44 = vadd.f32 %v628_v32, %v626_v25  ;;  %v825_v45 = vpop.f32.mrf.mxu1  ;;  %v845_v0 = vmul.f32 %v784_v4, %v1319_v48  ;;  %v870_v32 = vrot.slane %v869_v21, 2 }
  0xf0   : > { %v659_v51 = vadd.f32 %v629_v7, %v627_v41  ;;  %v877_v12 = vrot.slane %v876_v57, 2  ;;  %v846_v14 = vmul.f32 %v825_v45, %v1329_v52  ;;  %v863_v45 = vrot.slane %v862_v6, 2 }
  0xf1   : > { %v653_v54 = vrot.slane %v652_v44, 4  ;;  %v644_v49 = vadd.f32 %v643_v24, %v642_v11  ;;  %v871_v38 = vadd.f32 %v870_v32, %v869_v21 }
  0xf2   : > { %v660_v56 = vrot.slane %v659_v51, 4  ;;  %v878_v26 = vadd.f32 %v877_v12, %v876_v57 }
  0xf3   : > { %v654_v58 = vadd.f32 %v653_v54, %v652_v44  ;;  %v872_v12 = vrot.slane %v871_v38, 1 }
  0xf4   : > { %v661_v60 = vadd.f32 %v660_v56, %v659_v51  ;;  %v569_v61 = vpop.f32.mrf.mxu2  ;;  %v879_v50 = vrot.slane %v878_v26, 1 }
  0xf5   : > { %v655_v63 = vrot.slane %v654_v58, 2  ;;  %v610_v2 = vpop.f32.mrf.mxu3  ;;  %v630_v35 = vmul.f32 %v569_v61, %v1410_v39 }
  0xf6   : > { %v662_v5 = vrot.slane %v661_v60, 2  ;;  %v787_v9 = vpop.f32.mrf.mxu0  ;;  %v631_v37 = vmul.f32 %v610_v2, %v1403_v36 }
  0xf7   : > { %v656_v15 = vadd.f32 %v655_v63, %v654_v58  ;;  %v847_v16 = vmul.f32 %v787_v9, %v1315_v46  ;;  %v828_v33 = vpop.f32.mrf.mxu1  ;;  %v864_v63 = vadd.f32 %v863_v45, %v862_v6 }
  0xf8   : > { %v663_v19 = vadd.f32 %v662_v5, %v661_v60  ;;  %v848_v20 = vmul.f32 %v828_v33, %v1317_v47  ;;  %v706_v60 = vsel %vm445_vm4, %v644_v49, %v702_v27 }
  0xf9   : > { %v881_v22 = vadd.f32 %v847_v16, %v845_v0  ;;  %v657_v29 = vrot.slane %v656_v15, 1  ;;  %v880_v0 = vadd.f32 %v879_v50, %v878_v26  ;;  %v865_v21 = vrot.slane %v864_v63, 1 }
  0xfa   : > { %v664_v23 = vrot.slane %v663_v19, 1  ;;  %v888_v10 = vadd.f32 %v848_v20, %v846_v14 }
  0xfb   : > { %v882_v30 = vrot.slane %v881_v22, 4  ;;  %v658_v7 = vadd.f32 %v657_v29, %v656_v15 }
  0xfc   : > { %v665_v28 = vadd.f32 %v664_v23, %v663_v19  ;;  %v889_v25 = vrot.slane %v888_v10, 4  ;;  %v572_v31 = vpop.f32.mrf.mxu2  ;;  %v857_v19 = vadd.f32 %v856_v59, %v855_v1 }
  0xfd   : > { %v632_v40 = vmul.f32 %v572_v31, %v1398_v8  ;;  %v613_v41 = vpop.f32.mrf.mxu3  ;;  %v883_v34 = vadd.f32 %v882_v30, %v881_v22  ;;  %v918_v22 = vrot.slane %v880_v0, 4 }
  0xfe   : > { %v703_v4 = vrot.slane %v665_v28, 4  ;;  %v890_v42 = vadd.f32 %v889_v25, %v888_v10  ;;  %v633_v43 = vmul.f32 %v613_v41, %v1375_v18  ;;  %v790_v44 = vpop.f32.mrf.mxu0  ;;  %v873_v28 = vadd.f32 %v872_v12, %v871_v38 }
  0xff   : > { %v666_v51 = vadd.f32 %v632_v40, %v630_v35  ;;  %v831_v53 = vpop.f32.mrf.mxu1  ;;  %v884_v5 = vrot.slane %v883_v34, 2  ;;  %v849_v33 = vmul.f32 %v790_v44, %v1319_v48  ;;  %v858_v32 = vrot.slane %v857_v19, 1 }
 0x100   : > { %v707_v54 = vsel %vm445_vm4, %v658_v7, %v703_v4  ;;  %v891_v55 = vrot.slane %v890_v42, 2  ;;  %v673_v56 = vadd.f32 %v633_v43, %v631_v37  ;;  %v850_v26 = vmul.f32 %v831_v53, %v1329_v52 }
 0x101   : > { %v710_v57 = vrot.slane %v707_v54, 7  ;;  %v667_v58 = vrot.slane %v666_v51, 4  ;;  %v885_v6 = vadd.f32 %v884_v5, %v883_v34  ;;  %v866_v35 = vadd.f32 %v865_v21, %v864_v63 }
 0x102   : > { %v892_v61 = vadd.f32 %v891_v55, %v890_v42  ;;  %v674_v62 = vrot.slane %v673_v56, 4  ;;  %v922_v37 = vsel %vm445_vm4, %v873_v28, %v918_v22  ;;  %v859_v54 = vadd.f32 %v858_v32, %v857_v19 }
 0x103   : > { %v711_v2 = vsel %vm451_vm14, %v710_v57, %v706_v60  ;;  %v668_v3 = vadd.f32 %v667_v58, %v666_v51  ;;  %v886_v41 = vrot.slane %v885_v6, 1  ;;  %v917_v34 = vrot.slane %v866_v35, 4 }
 0x104   : > { %v712_v13 = vsel %vm453_vm15, %v710_v57, %v711_v2  ;;  %v675_v9 = vadd.f32 %v674_v62, %v673_v56  ;;  %v575_v11 = vpop.f32.mrf.mxu2  ;;  %v893_v15 = vrot.slane %v892_v61, 1  ;;  %v925_v59 = vrot.slane %v922_v37, 7 }
 0x105   : > { %v669_v16 = vrot.slane %v668_v3, 2  ;;  %v616_v17 = vpop.f32.mrf.mxu3  ;;  %v634_v7 = vmul.f32 %v575_v11, %v1410_v39  ;;  %v887_v38 = vadd.f32 %v886_v41, %v885_v6  ;;  %v921_v0 = vsel %vm445_vm4, %v859_v54, %v917_v34 }
 0x106   : > { %v676_v14 = vrot.slane %v675_v9, 2  ;;  %v793_v20 = vpop.f32.mrf.mxu0  ;;  %v894_v30 = vadd.f32 %v893_v15, %v892_v61  ;;  %v926_v12 = vsel %vm451_vm14, %v925_v59, %v921_v0 }
 0x107   : > { %v670_v29 = vadd.f32 %v669_v16, %v668_v3  ;;  %v851_v23 = vmul.f32 %v793_v20, %v1315_v46  ;;  %v834_v10 = vpop.f32.mrf.mxu1 }
 0x108   : > { %v677_v24 = vadd.f32 %v676_v14, %v675_v9  ;;  %v852_v27 = vmul.f32 %v834_v10, %v1317_v47  ;;  %v919_v52 = vrot.slane %v894_v30, 4  ;;  %v635_v47 = vmul.f32 %v616_v17, %v1403_v36 }
 0x109   : > { %v895_v25 = vadd.f32 %v851_v23, %v849_v33  ;;  %v671_v48 = vrot.slane %v670_v29, 1  ;;  %v927_v14 = vsel %vm453_vm15, %v925_v59, %v926_v12 }
 0x10a   : > { %v678_v31 = vrot.slane %v677_v24, 1  ;;  %v902_v1 = vadd.f32 %v852_v27, %v850_v26 }
 0x10b   : > { %v896_v40 = vrot.slane %v895_v25, 4  ;;  %v672_v49 = vadd.f32 %v671_v48, %v670_v29 }
 0x10c   : > { %v679_v46 = vadd.f32 %v678_v31, %v677_v24  ;;  %v903_v4 = vrot.slane %v902_v1, 4  ;;  %v578_v42 = vpop.f32.mrf.mxu2 }
 0x10d   : > { %v897_v43 = vadd.f32 %v896_v40, %v895_v25  ;;  %v636_v44 = vmul.f32 %v578_v42, %v1398_v8  ;;  %v619_v45 = vpop.f32.mrf.mxu3  ;;  %v923_v8 = vsel %vm445_vm4, %v887_v38, %v919_v52 }
 0x10e   : > { %v704_v50 = vrot.slane %v679_v46, 4  ;;  %v904_v51 = vadd.f32 %v903_v4, %v902_v1  ;;  %v637_v53 = vmul.f32 %v619_v45, %v1375_v18  ;;  %v928_v15 = vrot.slane %v923_v8, 6 }
 0x10f   : > { %v898_v55 = vrot.slane %v897_v43, 2  ;;  %v680_v56 = vadd.f32 %v636_v44, %v634_v7 }
 0x110   : > { %v708_v39 = vsel %vm445_vm4, %v672_v49, %v704_v50  ;;  %v905_v57 = vrot.slane %v904_v51, 2  ;;  %v687_v58 = vadd.f32 %v637_v53, %v635_v47  ;;  %v929_v22 = vsel %vm456_vm0, %v928_v15, %v927_v14 }
 0x111   : > { %v713_v36 = vrot.slane %v708_v39, 6  ;;  %v899_v60 = vadd.f32 %v898_v55, %v897_v43  ;;  %v681_v61 = vrot.slane %v680_v56, 4  ;;  %v930_v24 = vsel %vm458_vm1, %v928_v15, %v929_v22 }
 0x112   : > { %v906_v62 = vadd.f32 %v905_v57, %v904_v51  ;;  %v688_v63 = vrot.slane %v687_v58, 4 }
 0x113   : > { %v714_v18 = vsel %vm456_vm0, %v713_v36, %v712_v13  ;;  %v682_v2 = vadd.f32 %v681_v61, %v680_v56  ;;  %v900_v5 = vrot.slane %v899_v60, 1 }
 0x114   : > { %v715_v3 = vsel %vm458_vm1, %v713_v36, %v714_v18  ;;  %v907_v9 = vrot.slane %v906_v62, 1  ;;  %v689_v11 = vadd.f32 %v688_v63, %v687_v58 }
 0x115   : > { %v683_v16 = vrot.slane %v682_v2, 2  ;;  %v901_v20 = vadd.f32 %v900_v5, %v899_v60 }
 0x116   : > { %v908_v33 = vadd.f32 %v907_v9, %v906_v62  ;;  %v690_v17 = vrot.slane %v689_v11, 2 }
 0x117   : > { %v684_v19 = vadd.f32 %v683_v16, %v682_v2 }
 0x118   : > { %v920_v21 = vrot.slane %v908_v33, 4  ;;  %v691_v13 = vadd.f32 %v690_v17, %v689_v11 }
 0x119   : > { %v685_v23 = vrot.slane %v684_v19, 1 }
 0x11a   : > { %v924_v29 = vsel %vm445_vm4, %v901_v20, %v920_v21  ;;  %v692_v10 = vrot.slane %v691_v13, 1 }
 0x11b   : > { %v931_v6 = vrot.slane %v924_v29, 5  ;;  %v686_v30 = vadd.f32 %v685_v23, %v684_v19 }
 0x11c   : > { %v693_v26 = vadd.f32 %v692_v10, %v691_v13 }
 0x11d   : > { %v932_v27 = vsel %vm461_vm2, %v931_v6, %v930_v24 }
 0x11e   : > { %v933_v28 = vsel %vm463_vm3, %v931_v6, %v932_v27  ;;  %v705_v25 = vrot.slane %v693_v26, 4 }
 0x11f   : > { %1086 = vst [vmem:[%s1553_s16 + $0x10] sm:$0xff] %v933_v28 }
 0x120   : > { %v709_v48 = vsel %vm445_vm4, %v686_v30, %v705_v25 }
 0x121   : > { %v716_v31 = vrot.slane %v709_v48, 5 }
 0x123   : > { %v717_v1 = vsel %vm461_vm2, %v716_v31, %v715_v3 }
 0x124   : > { %v718_v32 = vsel %vm463_vm3, %v716_v31, %v717_v1 }
 0x125   : > { %1061 = vst [vmem:[%s1553_s16 + $0x8] sm:$0xff] %v718_v32 }
 0x126   : > { %1168 = shalt.err (!%p1165_p3)
}
 0x127   : > { %s1205_s5 = smov 128   ;;  %s1206_s6 = smov 256  }
 0x128   : > { %s1207_s7 = smov 8  }
 0x129   : > { %1099 = dma.vmem_to_hbm [thread:$0]  (%p1261_p5), %s951_s13, 384, %s953_s24, %s938_s25, %s1205_s5, %s1206_s6, %s1207_s7  }
 0x12a PF: > { %p1105_p4 = scmp.ge.s32.totalorder %s1203_s12, 2  ;;  %s967_s8 = sand.u32 1, %s1191_s9  }
 0x12b   : > { %s968_s14 = scalar_lea.sflag [#allocation3], %s967_s8 }
 0x12c   : > { %p1102_p7 = pnand %p1105_p4, %p1265_p6 }
 0x12e   : > { %p1103_p8 = pneg %p1102_p7 }
 0x130   : > { %1186 = dma.done.wait (%p1103_p8), %s968_s14, 384  }
 0x131   : > { %1188 = vsyncadd (%p1103_p8), %s968_s14, 4294966912  ;;  %p12_p9 = scmp.ge.s32.totalorder %s1248_s15, 4   ;;  %s1650_s9 = smov %s1195_s10 }
 0x132   : > { %s1651_s10 = smov %s1199_s11  ;;  %s1652_s11 = smov %s1259_s18 }
 0x133   : > { %s1653_s12 = smov %s1248_s15  ;;  %14 = sbr.rel (!%p12_p9) target bundleno = 3 (0x3), region = 67 }
 0x138   :  { %974 = vsyncpa [#allocation3], 1 }
 0x139   :  { %976 = vsyncpa [#allocation3 + $0x1], 1 }

</bundles_post_ra>
